<compile_context>
chip_gen: v6e
topology: v6e:2x2x1
jax: 0.10.0
libtpu: 0.0.40
codegen_flags: <defaults>
</compile_context>

<pallas_src>
import functools
import math

import jax
import jax.numpy as jnp
from jax import lax
from jax.experimental import pallas as pl
from jax.experimental.pallas import tpu as pltpu


def _round_up(x, m):
    return (x + m - 1) // m * m


def _activation(x, name):
    if name == "gelu":      # PyTorch nn.GELU() default (approximate='none')
        return 0.5 * x * (1.0 + lax.erf(x * (1.0 / math.sqrt(2.0))))
    if name == "relu":
        return jnp.maximum(x, 0.0)
    if name == "lrelu":
        return jnp.where(x >= 0.0, x, 0.2 * x)
    if name == "tanh":
        return jnp.tanh(x)
    if name == "sigmoid":
        return jax.nn.sigmoid(x)
    if name == "none":
        return x
    # TODO(synk): 'prelu' has a learned slope parameter; not modeled here.
    raise ValueError("Invalid activation")


def _mlp_kernel(*refs, part_dims, part_offs, d_total, act, mxu_dtype):
    # refs = [x_part_0..x_part_{p-1}, w1_p, b1_p, w2_p, b2_p, out, xcat_scratch]
    n_parts = len(part_dims)
    x_refs = refs[:n_parts]
    w1_ref, b1_ref, w2_ref, b2_ref = refs[n_parts:n_parts + 4]
    o_ref = refs[n_parts + 4]
    xcat_ref = refs[n_parts + 5]

    tm, Dp = xcat_ref.shape

    # In-VMEM "concat": each input part is stored into its column window of the
    # scratch (never materialized in HBM).  The padded lanes [d_total:Dp) are
    # re-zeroed every step (scratch is uninitialized and, under megacore grid
    # sharding, program_id(0)==0 may never run on the second core).
    if d_total < Dp:
        xcat_ref[:, d_total:] = jnp.zeros((tm, Dp - d_total), xcat_ref.dtype)
    for off, d, xr in zip(part_offs, part_dims, x_refs):
        xcat_ref[:, off:off + d] = xr[...]

    # Layer 1: one dense (tm, Dp) x (Dp, Dp) matmul, bf16 operands, f32 accumulation.
    acc = jnp.dot(xcat_ref[...].astype(mxu_dtype), w1_ref[...],
                  preferred_element_type=jnp.float32)
    h1 = _activation(acc + b1_ref[...], act)

    # Layer 2: lane-dense Dp x Dp matmul, unmasked 128-wide store.
    y = jnp.dot(h1.astype(mxu_dtype), w2_ref[...],
                preferred_element_type=jnp.float32) + b2_ref[...]
    o_ref[...] = y.astype(o_ref.dtype)


def _choose_tm(M, D, Dp, *, tm_default=2048, min_steps=2,
               vmem_budget=24 * 1024 * 1024, w_itemsize=2):
    # Cap tm so (a) it amortizes per-step overhead, (b) the grid has >= min_steps
    # steps when M allows (v7x: 2 TensorCores), (c) the pipeline fits the VMEM budget.
    tm = min(tm_default, max(8, _round_up(pl.cdiv(M, min_steps), 8)))

    def vmem_bytes(t):
        x_stream = 2 * t * D * 4                  # double-buffered f32 input parts
        out_stream = 2 * t * Dp * 4               # double-buffered f32 output
        weights = 2 * (2 * Dp * Dp * w_itemsize)  # w1+w2 (buffered twice)
        biases = 2 * (2 * Dp * 4)
        scratch = t * Dp * 4                      # xcat
        temps = 3 * t * Dp * 4                    # acc / h1 / bf16 copies headroom
        return x_stream + out_stream + weights + biases + scratch + temps

    while tm > 8 and vmem_bytes(tm) > vmem_budget:
        tm = max(8, _round_up(tm // 2, 8))
    return tm


def _fused_mlp(parts2d, part_dims, w1_p, b1_p, w2_p, b2_p, *, act="gelu",
               tm_default=2048):
    """parts2d: list of (M, d_i) f32 arrays. Weights pre-padded to Dp, bf16."""
    M = parts2d[0].shape[0]
    D = int(sum(part_dims))
    Dp = int(w2_p.shape[1])
    mxu_dtype = w1_p.dtype
    w_itemsize = jnp.dtype(mxu_dtype).itemsize

    tm = _choose_tm(M, D, Dp, tm_default=tm_default, w_itemsize=w_itemsize)
    Mp = _round_up(M, tm)
    if Mp != M:
        parts2d = [jnp.pad(x, ((0, Mp - M), (0, 0))) for x in parts2d]

    part_offs, o = [], 0
    for d in part_dims:
        part_offs.append(o)
        o += int(d)

    in_specs = (
        [pl.BlockSpec((tm, int(d)), lambda i: (i, 0)) for d in part_dims]
        + [pl.BlockSpec(tuple(w1_p.shape), lambda i: (0, 0)),
           pl.BlockSpec(tuple(b1_p.shape), lambda i: (0, 0)),
           pl.BlockSpec(tuple(w2_p.shape), lambda i: (0, 0)),
           pl.BlockSpec(tuple(b2_p.shape), lambda i: (0, 0))]
    )
    out_specs = pl.BlockSpec((tm, Dp), lambda i: (i, 0))

    kernel = functools.partial(
        _mlp_kernel,
        part_dims=tuple(int(d) for d in part_dims),
        part_offs=tuple(part_offs),
        d_total=D, act=act, mxu_dtype=mxu_dtype)

    cost = pl.CostEstimate(
        flops=int(2 * 2 * Mp * Dp * Dp),
        transcendentals=int(Mp * Dp),
        bytes_accessed=int(Mp * D * 4 + Mp * Dp * 4
                           + 2 * Dp * Dp * w_itemsize + 2 * Dp * 4),
    )

    y = pl.pallas_call(
        kernel,
        out_shape=jax.ShapeDtypeStruct((Mp, Dp), jnp.float32),
        grid_spec=pltpu.PrefetchScalarGridSpec(
            num_scalar_prefetch=0,
            grid=(Mp // tm,),
            in_specs=in_specs,
            out_specs=out_specs,
            scratch_shapes=[pltpu.VMEM((tm, Dp), jnp.float32)],
        ),
        compiler_params=pltpu.CompilerParams(
            dimension_semantics=("parallel",),
            vmem_limit_bytes=32 * 1024 * 1024,
        ),
        cost_estimate=cost,
    )(*parts2d, w1_p, b1_p, w2_p, b2_p)
    return y  # (Mp, Dp); caller slices once


class FeatureIABCAll:
    """JAX/Pallas port of feature_IABC_all (act='gelu')."""

    def __init__(self, img_query_dim, query_emb_dim, query_list, key, act="gelu"):
        self.img_query_dim = int(img_query_dim)
        self.query_emb_dim = int(query_emb_dim)
        self.query_list = list(query_list)
        self.act = act

        D = self.img_query_dim + self.query_emb_dim * len(self.query_list)
        self.input_dim = D
        Dp = _round_up(D, 128)            # lane-dense padded width
        self.Dp = Dp

        # nn.Linear default init: U(-1/sqrt(fan_in), 1/sqrt(fan_in)); store W as
        # (in, out) so the kernel computes x @ W + b (== PyTorch x @ W.T + b).
        k1w, k1b, k2w, k2b = jax.random.split(key, 4)
        bound = 1.0 / math.sqrt(D)
        self.w1 = jax.random.uniform(k1w, (D, D), jnp.float32, -bound, bound)
        self.b1 = jax.random.uniform(k1b, (D,), jnp.float32, -bound, bound)
        self.w2 = jax.random.uniform(k2w, (D, D), jnp.float32, -bound, bound)
        self.b2 = jax.random.uniform(k2b, (D,), jnp.float32, -bound, bound)

        # Padded (lane-dense) parameter copies built once at init.
        # Weights are stored in bfloat16 (MXU-native); biases stay f32.
        self.w1_p = jnp.pad(self.w1, ((0, 0), (0, Dp - D))).astype(jnp.bfloat16)
        self.w1_p = jnp.pad(self.w1_p, ((0, Dp - D), (0, 0)))   # (Dp, Dp) bf16
        self.b1_p = jnp.pad(self.b1, (0, Dp - D)).reshape(1, Dp)
        self.w2_p = jnp.pad(self.w2, ((0, Dp - D), (0, Dp - D))).astype(jnp.bfloat16)
        self.b2_p = jnp.pad(self.b2, (0, Dp - D)).reshape(1, Dp)

        # Per-part dims (img_query first, then sorted query keys): the kernel fuses
        # the feature concat into VMEM column stores using these offsets.
        self.part_dims = [self.img_query_dim] + [self.query_emb_dim] * len(self.query_list)

    def __call__(self, extractor_dict, pos_emb, query_emb, N):
        img_query = extractor_dict["img_query"]            # (B, N, img_query_dim)
        keys = sorted(list(query_emb.keys()))
        parts3d = [img_query] + [query_emb[k] for k in keys]

        B, Nq = img_query.shape[0], img_query.shape[1]
        M, D = B * Nq, self.input_dim
        parts2d = [p.reshape(M, p.shape[-1]).astype(jnp.float32) for p in parts3d]

        # TODO(synk): value_pos_emb / attention_list branch of the reference uses
        # undefined members and does not contribute to the output; not translated.

        y = _fused_mlp(parts2d, self.part_dims, self.w1_p, self.b1_p,
                       self.w2_p, self.b2_p, act=self.act)   # (Mp, Dp)
        if y.shape != (M, D):
            y = y[:M, :D]                                    # single slice pass
        output = y.reshape(B, Nq * D)                        # 'B N V -> B (N V)'
        return output, {}


def _reference(model, extractor_dict, query_emb, *, bf16_matmul=True):
    keys = sorted(list(query_emb.keys()))
    x = jnp.concatenate([extractor_dict["img_query"]] + [query_emb[k] for k in keys],
                        axis=2).astype(jnp.float32)
    B, Nq, D = x.shape
    x2 = x.reshape(B * Nq, D)
    if bf16_matmul:
        h = jnp.dot(x2.astype(jnp.bfloat16), model.w1.astype(jnp.bfloat16),
                    preferred_element_type=jnp.float32) + model.b1
    else:
        h = x2 @ model.w1 + model.b1
    h = 0.5 * h * (1.0 + lax.erf(h / math.sqrt(2.0)))
    if bf16_matmul:
        y = jnp.dot(h.astype(jnp.bfloat16), model.w2.astype(jnp.bfloat16),
                    preferred_element_type=jnp.float32) + model.b2
    else:
        y = h @ model.w2 + model.b2
    return y.reshape(B, Nq * D)


if __name__ == "__main__":
    key = jax.random.PRNGKey(0)
    k_model, k_img, k_pos, k_feat = jax.random.split(key, 4)

    img_query_dim, query_emb_dim = 4, 32
    query_list = ["feat", "pos"]
    B, N = 2, 8

    model = FeatureIABCAll(img_query_dim, query_emb_dim, query_list, k_model)

    extractor_dict = {
        "img_query": jax.random.normal(k_img, (B, N, img_query_dim), jnp.float32),
        "key_feature": jnp.zeros((B, N, 8), jnp.float32),   # unused by translated path
    }
    query_emb = {
        "pos": jax.random.normal(k_pos, (B, N, query_emb_dim), jnp.float32),
        "feat": jax.random.normal(k_feat, (B, N, query_emb_dim), jnp.float32),
    }

    output, aux = model(extractor_dict, None, query_emb, N)
    output = jax.block_until_ready(output)

    D = model.input_dim
    assert output.shape == (B, N * D), output.shape
    assert aux == {}

    # Check vs a matching-precision reference (bf16 operands, f32 accumulation) ...
    ref_bf16 = _reference(model, extractor_dict, query_emb, bf16_matmul=True)
    assert jnp.allclose(output, ref_bf16, atol=2e-3, rtol=2e-3), \
        float(jnp.max(jnp.abs(output - ref_bf16)))
    # ... and a loose sanity check vs the full-f32 reference.
    ref_f32 = _reference(model, extractor_dict, query_emb, bf16_matmul=False)
    assert jnp.allclose(output, ref_f32, atol=5e-2, rtol=5e-2), \
        float(jnp.max(jnp.abs(output - ref_f32)))

    print("KERNEL_OK")
</pallas_src>

<mosaic_0001>
module attributes {stable_mosaic.version = 11 : i64} {
  func.func @_mlp_kernel(%arg0: i32, %arg1: memref<8x4xf32, #tpu.memory_space<vmem>>, %arg2: memref<8x32xf32, #tpu.memory_space<vmem>>, %arg3: memref<8x32xf32, #tpu.memory_space<vmem>>, %arg4: memref<128x128xbf16, #tpu.memory_space<vmem>>, %arg5: memref<1x128xf32, #tpu.memory_space<vmem>>, %arg6: memref<128x128xbf16, #tpu.memory_space<vmem>>, %arg7: memref<1x128xf32, #tpu.memory_space<vmem>>, %arg8: memref<8x128xf32, #tpu.memory_space<vmem>>, %arg9: memref<8x128xf32, #tpu.memory_space<vmem>>) attributes {dimension_semantics = [#tpu.dimension_semantics<parallel>], iteration_bounds = array<i64: 2>, scalar_prefetch = 0 : i64, scratch_operands = 1 : i64, tpu.core_type = #tpu.core_type<tc>, window_params = [{transform_indices = @transform_0, window_bounds = array<i64: 8, 4>}, {transform_indices = @transform_1, window_bounds = array<i64: 8, 32>}, {transform_indices = @transform_2, window_bounds = array<i64: 8, 32>}, {pipeline_mode = #tpu.pipeline_mode<synchronous>, transform_indices = @transform_3, window_bounds = array<i64: 128, 128>}, {pipeline_mode = #tpu.pipeline_mode<synchronous>, transform_indices = @transform_4, window_bounds = array<i64: 1, 128>}, {pipeline_mode = #tpu.pipeline_mode<synchronous>, transform_indices = @transform_5, window_bounds = array<i64: 128, 128>}, {pipeline_mode = #tpu.pipeline_mode<synchronous>, transform_indices = @transform_6, window_bounds = array<i64: 1, 128>}, {transform_indices = @transform_7, window_bounds = array<i64: 8, 128>}]} {
    %cst = arith.constant 0.000000e+00 : f32
    %0 = vector.broadcast %cst : f32 to vector<8x60xf32>
    %c0 = arith.constant 0 : index
    %c68 = arith.constant 68 : index
    %1 = vector.load %arg9[%c0, %c68] : memref<8x128xf32, #tpu.memory_space<vmem>>, vector<8x60xf32>
    tpu.vector_store %arg9[%c0, %c68], %0 {strides = array<i32>} : memref<8x128xf32, #tpu.memory_space<vmem>>, vector<8x60xf32>,
    %c0_0 = arith.constant 0 : index
    %c0_1 = arith.constant 0 : index
    %2 = vector.load %arg1[%c0_0, %c0_1] : memref<8x4xf32, #tpu.memory_space<vmem>>, vector<8x4xf32>
    %c0_2 = arith.constant 0 : index
    %c0_3 = arith.constant 0 : index
    %3 = vector.load %arg9[%c0_2, %c0_3] : memref<8x128xf32, #tpu.memory_space<vmem>>, vector<8x4xf32>
    tpu.vector_store %arg9[%c0_2, %c0_3], %2 {strides = array<i32>} : memref<8x128xf32, #tpu.memory_space<vmem>>, vector<8x4xf32>,
    %c0_4 = arith.constant 0 : index
    %c0_5 = arith.constant 0 : index
    %4 = vector.load %arg2[%c0_4, %c0_5] : memref<8x32xf32, #tpu.memory_space<vmem>>, vector<8x32xf32>
    %c0_6 = arith.constant 0 : index
    %c4 = arith.constant 4 : index
    %5 = vector.load %arg9[%c0_6, %c4] : memref<8x128xf32, #tpu.memory_space<vmem>>, vector<8x32xf32>
    tpu.vector_store %arg9[%c0_6, %c4], %4 {strides = array<i32>} : memref<8x128xf32, #tpu.memory_space<vmem>>, vector<8x32xf32>,
    %c0_7 = arith.constant 0 : index
    %c0_8 = arith.constant 0 : index
    %6 = vector.load %arg3[%c0_7, %c0_8] : memref<8x32xf32, #tpu.memory_space<vmem>>, vector<8x32xf32>
    %c0_9 = arith.constant 0 : index
    %c36 = arith.constant 36 : index
    %7 = vector.load %arg9[%c0_9, %c36] : memref<8x128xf32, #tpu.memory_space<vmem>>, vector<8x32xf32>
    tpu.vector_store %arg9[%c0_9, %c36], %6 {strides = array<i32>} : memref<8x128xf32, #tpu.memory_space<vmem>>, vector<8x32xf32>,
    %c0_10 = arith.constant 0 : index
    %c0_11 = arith.constant 0 : index
    %8 = vector.load %arg9[%c0_10, %c0_11] : memref<8x128xf32, #tpu.memory_space<vmem>>, vector<8x128xf32>
    %9 = arith.truncf %8 : vector<8x128xf32> to vector<8x128xbf16>
    %c0_12 = arith.constant 0 : index
    %c0_13 = arith.constant 0 : index
    %10 = vector.load %arg4[%c0_12, %c0_13] : memref<128x128xbf16, #tpu.memory_space<vmem>>, vector<128x128xbf16>
    %cst_14 = arith.constant dense<0.000000e+00> : vector<8x128xf32>
    %11 = tpu.matmul %9, %10, %cst_14 {dimension_numbers = #tpu.dot_dimension_numbers<[1], [0], [0], [1], [0, 0, 1, 1], [], []>} : vector<8x128xbf16>, vector<128x128xbf16>, vector<8x128xf32> -> vector<8x128xf32>
    %c0_15 = arith.constant 0 : index
    %c0_16 = arith.constant 0 : index
    %12 = vector.load %arg5[%c0_15, %c0_16] : memref<1x128xf32, #tpu.memory_space<vmem>>, vector<1x128xf32>
    %13 = vector.broadcast %12 : vector<1x128xf32> to vector<8x128xf32>
    %14 = arith.addf %11, %13 : vector<8x128xf32>
    %cst_17 = arith.constant 5.000000e-01 : f32
    %15 = vector.broadcast %cst_17 : f32 to vector<8x128xf32>
    %16 = arith.mulf %15, %14 : vector<8x128xf32>
    %cst_18 = arith.constant 0.707106769 : f32
    %17 = vector.broadcast %cst_18 : f32 to vector<8x128xf32>
    %18 = arith.mulf %14, %17 : vector<8x128xf32>
    %19 = math.erf %18 : vector<8x128xf32>
    %cst_19 = arith.constant 1.000000e+00 : f32
    %20 = vector.broadcast %cst_19 : f32 to vector<8x128xf32>
    %21 = arith.addf %20, %19 : vector<8x128xf32>
    %22 = arith.mulf %16, %21 : vector<8x128xf32>
    %23 = arith.truncf %22 : vector<8x128xf32> to vector<8x128xbf16>
    %c0_20 = arith.constant 0 : index
    %c0_21 = arith.constant 0 : index
    %24 = vector.load %arg6[%c0_20, %c0_21] : memref<128x128xbf16, #tpu.memory_space<vmem>>, vector<128x128xbf16>
    %cst_22 = arith.constant dense<0.000000e+00> : vector<8x128xf32>
    %25 = tpu.matmul %23, %24, %cst_22 {dimension_numbers = #tpu.dot_dimension_numbers<[1], [0], [0], [1], [0, 0, 1, 1], [], []>} : vector<8x128xbf16>, vector<128x128xbf16>, vector<8x128xf32> -> vector<8x128xf32>
    %c0_23 = arith.constant 0 : index
    %c0_24 = arith.constant 0 : index
    %26 = vector.load %arg7[%c0_23, %c0_24] : memref<1x128xf32, #tpu.memory_space<vmem>>, vector<1x128xf32>
    %27 = vector.broadcast %26 : vector<1x128xf32> to vector<8x128xf32>
    %28 = arith.addf %25, %27 : vector<8x128xf32>
    %c0_25 = arith.constant 0 : index
    %c0_26 = arith.constant 0 : index
    %29 = vector.load %arg8[%c0_25, %c0_26] : memref<8x128xf32, #tpu.memory_space<vmem>>, vector<8x128xf32>
    tpu.vector_store %arg8[%c0_25, %c0_26], %28 {strides = array<i32>} : memref<8x128xf32, #tpu.memory_space<vmem>>, vector<8x128xf32>,
    return
  }
  func.func @transform_0(%arg0: i32) -> (i32, i32) {
    %c0_i32 = arith.constant 0 : i32
    %c0_i32_0 = arith.constant 0 : i32
    return %arg0, %c0_i32 : i32, i32
  }
  func.func @transform_1(%arg0: i32) -> (i32, i32) {
    %c0_i32 = arith.constant 0 : i32
    %c0_i32_0 = arith.constant 0 : i32
    return %arg0, %c0_i32 : i32, i32
  }
  func.func @transform_2(%arg0: i32) -> (i32, i32) {
    %c0_i32 = arith.constant 0 : i32
    %c0_i32_0 = arith.constant 0 : i32
    return %arg0, %c0_i32 : i32, i32
  }
  func.func @transform_3(%arg0: i32) -> (i32, i32) {
    %c0_i32 = arith.constant 0 : i32
    %c0_i32_0 = arith.constant 0 : i32
    %c0_i32_1 = arith.constant 0 : i32
    return %c0_i32, %c0_i32_0 : i32, i32
  }
  func.func @transform_4(%arg0: i32) -> (i32, i32) {
    %c0_i32 = arith.constant 0 : i32
    %c0_i32_0 = arith.constant 0 : i32
    %c0_i32_1 = arith.constant 0 : i32
    return %c0_i32, %c0_i32_0 : i32, i32
  }
  func.func @transform_5(%arg0: i32) -> (i32, i32) {
    %c0_i32 = arith.constant 0 : i32
    %c0_i32_0 = arith.constant 0 : i32
    %c0_i32_1 = arith.constant 0 : i32
    return %c0_i32, %c0_i32_0 : i32, i32
  }
  func.func @transform_6(%arg0: i32) -> (i32, i32) {
    %c0_i32 = arith.constant 0 : i32
    %c0_i32_0 = arith.constant 0 : i32
    %c0_i32_1 = arith.constant 0 : i32
    return %c0_i32, %c0_i32_0 : i32, i32
  }
  func.func @transform_7(%arg0: i32) -> (i32, i32) {
    %c0_i32 = arith.constant 0 : i32
    %c0_i32_0 = arith.constant 0 : i32
    return %arg0, %c0_i32 : i32, i32
  }
}

</mosaic_0001>

<bundles_post_ra>
// kernel: tpu_custom_call.1
= control target key start
LH: loop header
LB: loop body
LE: loop exit
PB: predicated region body
PF: predicated region fallthrough
CT: control target
= control target key end

     0   :  { %s1334_s0 = inlined_call_operand.vmem [shape: f32[16,4], index: 0, kind: input, shape index: {}]   ;;  %s1335_s1 = inlined_call_operand.vmem [shape: f32[16,32], index: 1, kind: input, shape index: {}]   ;;  %s1336_s2 = inlined_call_operand.hbm [shape: f32[16,32], index: 2, kind: input, shape index: {}]   ;;  %s1337_s3 = inlined_call_operand.hbm [shape: bf16[128,128], index: 3, kind: input, shape index: {}]   ;;  %s1338_s4 = inlined_call_operand.vmem [shape: f32[1,128], index: 4, kind: input, shape index: {}]   ;;  %s1339_s5 = inlined_call_operand.hbm [shape: bf16[128,128], index: 5, kind: input, shape index: {}]   ;;  %s1340_s6 = inlined_call_operand.vmem [shape: f32[1,128], index: 6, kind: input, shape index: {}]   ;;  %s1341_s7 = inlined_call_operand.hbm [shape: f32[16,128], index: 7, kind: output, shape index: {}]  }
   0x1   :  { %1346 = sst [smem:[#allocation13_spill]] %s1337_s3 }
   0x2   :  { %1347 = sst [smem:[#allocation14_spill]] %s1339_s5 }
   0x3   :  { %12 = vsyncpa [#allocation4], 0 }
   0x4   :  { %14 = vsyncpa [#allocation4 + $0x1], 0 }
   0x5   :  { %15 = vsyncpa [#allocation7], 0 }
   0x6   :  { %16 = vsyncpa [#allocation5], 0 }
   0x7   :  { %18 = vsyncpa [#allocation5 + $0x1], 0  ;;  %s1120_s24 = smov 0   ;;  %s1122_s25 = smov 0  }
   0x8   :  { %s1124_s26 = smov 0   ;;  %s1126_s27 = smov 0  }
   0x9 LB: > { %s1141_s28 = sadd.s32 4294967295, %s1068_s27   ;;  %s735_s29 = sadd.s32 4294967294, %s1068_s27   ;;  %s1068_s27 = sphi %s1126_s27, %s1367_s27   ;;  %s1064_s26 = sphi %s1124_s26, %s1366_s26   ;;  %s1060_s25 = sphi %s1122_s25, %s1365_s25   ;;  %s1056_s24 = sphi %s1120_s24, %s1364_s24  }
   0xa   : > { %p96_p0 = scmp.ne.s32.totalorder %s1060_s25, %s1056_s24  ;;  %p1342_p1 = scmp.eq.s32.totalorder %s1141_s28, 0 }
   0xb   : > { %p210_p3 = scmp.eq.s32.totalorder %s735_s29, 1  ;;  %p736_p5 = scmp.ge.s32.totalorder %s1068_s27, 1 }
   0xc   : > { %p1150_p4 = por %p1342_p1, %p96_p0  ;;  %p217_p7 = scmp.lt.s32.totalorder %s1068_s27, 3 }
   0xd   : > { %p1155_p6 = por %p210_p3, %p96_p0  ;;  %s1070_s10 = smov [#allocation6]  }
   0xe   : > { %s1348_s30 = scalar_select %p1150_p4, 1, 0 }
   0xf   : > { %s1349_s8 = scalar_select %p1155_p6, 1, 0 }
  0x10   : > { %p1160_p8 = pnand %p736_p5, %p217_p7  ;;  %s229_s11 = sshll.u32 %s1070_s10, 4  ;;  %s230_s11 = int_to_ptr.vmem [resolvable:$true] %s229_s11 }
  0x11   : > { %s1071_s13 = smov [#allocation8]   ;;  %s931_s15 = scalar_lea.vmem %s230_s11, 1024 }
  0x12   : > { %s1350_s9 = scalar_select %p1160_p8, 1, 0 }
  0x13   : > { %p841_p9 = pneg %p1160_p8  ;;  %s245_s14 = sshll.u32 %s1071_s13, 4  ;;  %s246_s14 = int_to_ptr.vmem [resolvable:$true] %s245_s14 }
  0x14   : > { %p932_p13 = scmp.ne.s32.totalorder %s230_s11, %s931_s15  ;;  %p939_p5 = scmp.lt.s32.totalorder %s230_s11, %s230_s11 }
  0x15   : > { %p1169_p11 = pnand %p841_p9, %p1342_p1  ;;  %p940_p7 = scmp.lt.s32.totalorder %s931_s15, %s931_s15 }
  0x17   : > { %p922_p12 = pneg %p1169_p11  ;;  %p941_p10 = por %p940_p7, %p939_p5 }
  0x19   : > { %p934_p0 = pnand %p932_p13, %p922_p12 }
  0x1b   : > { %p935_p3 = pneg %p934_p0 }
  0x1d   : > { %p942_p9 = pnand %p941_p10, %p935_p3 }
  0x1f   : > { %945 = shalt.err (!%p942_p9)
}
  0x20   : > { %s1072_s16 = smov 64   ;;  %s1073_s17 = smov 4  }
  0x21   : > { %s1352_s3 = sld [smem:[#allocation13_spill]]  ;;  %s957_s20 = scalar_lea.vmem %s246_s14, 1024 }
  0x22   : > { %p958_p1 = scmp.ne.s32.totalorder %s246_s14, %s957_s20  ;;  %p965_p2 = scmp.lt.s32.totalorder %s246_s14, %s246_s14 }
  0x23   : > { %p966_p6 = scmp.lt.s32.totalorder %s957_s20, %s957_s20 }
  0x24   : > { %p960_p13 = pnand %p958_p1, %p922_p12 }
  0x25   : > { %p967_p5 = por %p966_p6, %p965_p2 }
  0x26   : > { %p961_p0 = pneg %p960_p13 }
  0x27   : > { %844 = dma.hbm_to_vmem [thread:$0]  (!%p1169_p11), %s1352_s3, 1024, %s230_s11, [#allocation7], %s1072_s16, %s1072_s16, %s1073_s17  }
  0x28   : > { %p968_p10 = pnand %p967_p5, %p961_p0 }
  0x2a   : > { %971 = shalt.err (!%p968_p10)
}
  0x2b   : > { %s1353_s5 = sld [smem:[#allocation14_spill]]  ;;  %s1192_s23 = sadd.s32 1, %s1068_s27  }
  0x2c   : > { %s83_s29 = sadd.s32 1, %s1064_s26  ;;  %s80_s10 = ssub.s32 %s1068_s27, %s1192_s23 }
  0x2d   : > { %p90_p1 = scmp.ne.s32.totalorder %s1064_s26, %s1060_s25  ;;  %p81_p2 = scmp.eq.s32.totalorder %s80_s10, 0 }
  0x2e   : > { %p91_p6 = scmp.eq.s32.totalorder %s1068_s27, 0  ;;  %p1354_p12 = scmp.eq.s32.totalorder %s1141_s28, 1 }
  0x2f   : > { %p858_p7 = scmp.lt.s32.totalorder %s1068_s27, 2  ;;  %s276_s13 = sand.u32 1, %s1064_s26  }
  0x30   : > { %p1202_p3 = por %p1354_p12, %p90_p1  ;;  %p92_p9 = por %p91_p6, %p90_p1 }
  0x31   : > { %847 = dma.hbm_to_vmem [thread:$0]  (!%p1169_p11), %s1353_s5, 1024, %s246_s14, [#allocation7], %s1072_s16, %s1072_s16, %s1073_s17  }
  0x32   : > { %s1355_s11 = scalar_select %p1202_p3, 1, 0 }
  0x33   : > { %s1208_s12 = scalar_select %p81_p2, %s1064_s26, %s83_s29  }
  0x34   : > { %s740_s15 = sshll.u32 %s276_s13, 3  ;;  %s741_s14 = sshll.u32 %s1068_s27, 7 }
  0x35   : > { %s1215_s18 = scalar_lea.hbm %s1336_s2, %s741_s14  ;;  %s280_s19 = scalar_lea.vmem [#allocation3], %s740_s15 }
  0x36   : > { %s287_s20 = sshll.u32 %s280_s19, 4  ;;  %p1217_p11 = pnand %p858_p7, %p92_p9  ;;  %s288_s20 = int_to_ptr.vmem [resolvable:$true] %s287_s20 }
  0x37   : > { %s277_s22 = scalar_lea.sflag [#allocation4], %s276_s13  ;;  %s972_s29 = scalar_lea.hbm %s1215_s18, 128 }
  0x38   : > { %p973_p13 = scmp.ne.s32.totalorder %s1215_s18, %s972_s29  ;;  %p974_p0 = pneg %p1217_p11 }
  0x39   : > { %s977_s16 = scalar_lea.hbm %s1336_s2, 256  ;;  %p978_p1 = scmp.lt.s32.totalorder %s1215_s18, %s1336_s2 }
  0x3a   : > { %p975_p5 = pnand %p974_p0, %p973_p13  ;;  %p979_p2 = scmp.lt.s32.totalorder %s977_s16, %s972_s29 }
  0x3c   : > { %p976_p10 = pneg %p975_p5  ;;  %p980_p6 = por %p979_p2, %p978_p1 }
  0x3e   : > { %p981_p12 = pnand %p980_p6, %p976_p10 }
  0x40   : > { %984 = shalt.err (!%p981_p12)
}
  0x41   : > { %s985_s19 = scalar_lea.vmem %s288_s20, 128  ;;  %s1074_s13 = smov [#allocation3]  }
  0x42   : > { %p986_p7 = scmp.ne.s32.totalorder %s288_s20, %s985_s19  ;;  %s990_s3 = sshll.u32 %s1074_s13, 4  ;;  %s991_s3 = int_to_ptr.vmem [resolvable:$false] %s990_s3 }
  0x43   : > { %s992_s5 = scalar_lea.vmem %s991_s3, 256  ;;  %p993_p13 = scmp.lt.s32.totalorder %s288_s20, %s991_s3 }
  0x44   : > { %p988_p9 = pnand %p986_p7, %p974_p0  ;;  %p994_p5 = scmp.lt.s32.totalorder %s992_s5, %s985_s19 }
  0x46   : > { %p989_p3 = pneg %p988_p9  ;;  %p995_p4 = por %p994_p5, %p993_p13 }
  0x48   : > { %p996_p8 = pnand %p995_p4, %p989_p3 }
  0x4a   : > { %999 = shalt.err (!%p996_p8)
}
  0x4b   : > { %851 = dma.hbm_to_vmem [thread:$0]  (!%p1217_p11), %s1215_s18, 128, %s288_s20, %s277_s22  }
  0x4c   : > { %p1357_p10 = scmp.ne.s32.totalorder %s1350_s9, 0 }
  0x4d   : > { %s1238_s29 = sand.u32 (!%p1357_p10), 1, %s1060_s25   ;;  %p1358_p4 = scmp.ne.s32.totalorder (!%p1357_p10), %s1348_s30, 0 }
  0x4e   : > { %296 = sbr.rel (%p1357_p10) target bundleno = 649 (0x289), region = 48  ;;  %s743_s10 = sshll.u32 (!%p1357_p10), %s1238_s29, 3 }
  0x4f   : > { %s299_s3 = scalar_lea.sflag (!%p1357_p10), [#allocation4], %s1238_s29  ;;  %s302_s5 = scalar_lea.vmem (!%p1357_p10), [#allocation3], %s743_s10 }
  0x53   : > { %1043 = dma.done.wait (%p1358_p4), %s299_s3, 128  }
  0x54   : > { %1045 = vsyncadd (%p1358_p4), %s299_s3, 4294967168  ;;  %p1359_p8 = scmp.eq.s32.totalorder %s1141_s28, 0 }
  0x56   : > { %1047 = dma.done.wait (%p1359_p8), [#allocation7], 2048   ;;  %p1360_p3 = pmov %p1359_p8 }
  0x57   : > { %p349_p11 = scmp.lt.s32.totalorder %s1141_s28, 1  ;;  %vm358_vm0 = vcmask 1048096   ;;  %v1075_v0 = vmov 0.0   ;;  %vm1076_vm1 = vmmov 0   ;;  %vm361_vm2 = vcmask 31744   ;;  %s1077_s17 = smov 4  }
  0x58   : > { %1049 = vsyncadd (%p1360_p3), [#allocation7], 4294965248  ;;  %789 = vmatprep.subr.bf16.mxu0 %v1075_v0  ;;  %359 = vst.msk [vmem:[#allocation2] sm:$0xff] %vm358_vm0, %v1075_v0  ;;  %809 = vmatprep.subr.bf16.mxu1 %v1075_v0  ;;  %v902_v3 = vld [vmem:[#allocation6 + $0x38] sm:$0xff]   ;;  %v903_v5 = vld [vmem:[#allocation6 + $0x30] sm:$0xff]   ;;  %s1078_s15 = smov 36  }
  0x59   : > { %s350_s9 = scalar_select %p349_p11, %s1141_s28, 1  ;;  %805 = vmatprep.mubr.msk.bf16.mxu0 %vm1076_vm1, %v1075_v0  ;;  %825 = vmatprep.mubr.msk.bf16.mxu1 %vm1076_vm1, %v1075_v0  ;;  %v370_v4 = vld [vmem:[%s302_s5] sm:$0xff]  ;;  %v904_v6 = vld [vmem:[#allocation6 + $0x28] sm:$0xff]   ;;  %v905_v8 = vld [vmem:[#allocation6 + $0x20] sm:$0xff]   ;;  %vm368_vm3 = vcmask 293920   ;;  %vm375_vm4 = vcmask 556320  }
  0x5a   : > { %790 = vmatpush3.bf16.msra.mxu0 %v902_v3  ;;  %v910_v7 = vld [vmem:[#allocation8 + $0x38] sm:$0xff]   ;;  %v911_v9 = vld [vmem:[#allocation8 + $0x30] sm:$0xff]   ;;  %v908_v12 = vld [vmem:[#allocation6 + $0x8] sm:$0xff]   ;;  %s609_s14 = scalar_lea.sflag [#allocation5], %s1238_s29  ;;  %p1361_p1 = scmp.ne.s32.totalorder %s1355_s11, 0 }
  0x5b   : > { %s747_s30 = sshll.u32 %s350_s9, 3  ;;  %791 = vmatprep.subr.bf16.mxu0 %v1075_v0  ;;  %810 = vmatpush3.bf16.msra.mxu1 %v910_v7  ;;  %v906_v10 = vld [vmem:[#allocation6 + $0x18] sm:$0xff]   ;;  %v907_v11 = vld [vmem:[#allocation6 + $0x10] sm:$0xff]   ;;  %v909_v13 = vld [vmem:[#allocation6] sm:$0xff]   ;;  %s768_s9 = sshll.u32 %s1141_s28, 7 }
  0x5c   : > { %s352_s21 = scalar_lea.vmem %s1334_s0, %s747_s30  ;;  %s356_s16 = scalar_lea.vmem %s1335_s1, %s747_s30  ;;  %811 = vmatprep.subr.bf16.mxu1 %v1075_v0  ;;  %v912_v18 = vld [vmem:[#allocation8 + $0x28] sm:$0xff]   ;;  %v913_v19 = vld [vmem:[#allocation8 + $0x20] sm:$0xff]   ;;  %v914_v20 = vld [vmem:[#allocation8 + $0x18] sm:$0xff]  }
  0x5d   : > { %v363_v1 = vld [vmem:[%s356_s16] sm:$0xff]  ;;  %v915_v21 = vld [vmem:[#allocation8 + $0x10] sm:$0xff]   ;;  %v917_v23 = vld [vmem:[#allocation8] sm:$0xff]   ;;  %s348_s30 = scalar_lea.vmem [#allocation9], %s743_s10  ;;  %s1291_s22 = scalar_lea.hbm %s1341_s7, %s768_s9 }
  0x5e   : > { %v360_v2 = vld [vmem:[%s352_s21] sm:$0xff]  ;;  %365 = vrot.lane.b32.xlu0 %v363_v1, %s1077_s17  ;;  %792 = vmatpush3.bf16.msra.mxu0 %v903_v5  ;;  %s622_s18 = sshll.u32 %s348_s30, 4  ;;  %s1079_s10 = smov [#allocation9]   ;;  %s1293_s18 = int_to_ptr.vmem [resolvable:$true] %s622_s18 }
  0x5f   : > { %362 = vst.msk [vmem:[#allocation2] sm:$0xff] %vm361_vm2, %v360_v2  ;;  %793 = vmatprep.subr.bf16.mxu0 %v1075_v0  ;;  %812 = vmatpush3.bf16.msra.mxu1 %v911_v9  ;;  %v916_v22 = vld [vmem:[#allocation8 + $0x8] sm:$0xff]   ;;  %s1000_s28 = scalar_lea.vmem %s1293_s18, 128  ;;  %s1004_s16 = sshll.u32 %s1079_s10, 4  ;;  %s1005_s16 = int_to_ptr.vmem [resolvable:$false] %s1004_s16 }
  0x60   : > { %813 = vmatprep.subr.bf16.mxu1 %v1075_v0  ;;  %v749_v24 = vld [vmem:[%s1338_s4] ss:$0 sm:$0xff]  ;;  %p1001_p0 = scmp.ne.s32.totalorder %s1293_s18, %s1000_s28  ;;  %s1006_s17 = scalar_lea.vmem %s1005_s16, 256 }
  0x61   : > { %v758_v36 = vld [vmem:[%s1340_s6] ss:$0 sm:$0xff]  ;;  %p1007_p12 = scmp.lt.s32.totalorder %s1293_s18, %s1005_s16  ;;  %p1008_p7 = scmp.lt.s32.totalorder %s1006_s17, %s1000_s28 }
  0x62   : > { %372 = vrot.lane.b32.xlu0 %v370_v4, %s1078_s15  ;;  %794 = vmatpush3.bf16.msra.mxu0 %v904_v6  ;;  %p1002_p2 = pnand %p1001_p0, %p1361_p1 }
  0x63   : > { %795 = vmatprep.subr.bf16.mxu0 %v1075_v0  ;;  %814 = vmatpush3.bf16.msra.mxu1 %v912_v18  ;;  %p1009_p9 = por %p1008_p7, %p1007_p12 }
  0x64   : > { %815 = vmatprep.subr.bf16.mxu1 %v1075_v0  ;;  %p1003_p6 = pneg %p1002_p2 }
  0x66   : > { %796 = vmatpush3.bf16.msra.mxu0 %v905_v8  ;;  %p1010_p13 = pnand %p1009_p9, %p1003_p6 }
  0x67   : > { %797 = vmatprep.subr.bf16.mxu0 %v1075_v0  ;;  %816 = vmatpush3.bf16.msra.mxu1 %v913_v19 }
  0x68   : > { %817 = vmatprep.subr.bf16.mxu1 %v1075_v0 }
  0x6a   : > { %798 = vmatpush3.bf16.msra.mxu0 %v906_v10 }
  0x6b   : > { %799 = vmatprep.subr.bf16.mxu0 %v1075_v0  ;;  %818 = vmatpush3.bf16.msra.mxu1 %v914_v20 }
  0x6c   : > { %819 = vmatprep.subr.bf16.mxu1 %v1075_v0 }
  0x6e   : > { %800 = vmatpush3.bf16.msra.mxu0 %v907_v11 }
  0x6f   : > { %801 = vmatprep.subr.bf16.mxu0 %v1075_v0  ;;  %820 = vmatpush3.bf16.msra.mxu1 %v915_v21 }
  0x70   : > { %821 = vmatprep.subr.bf16.mxu1 %v1075_v0 }
  0x72   : > { %802 = vmatpush3.bf16.msra.mxu0 %v908_v12 }
  0x73   : > { %803 = vmatprep.subr.bf16.mxu0 %v1075_v0  ;;  %822 = vmatpush3.bf16.msra.mxu1 %v916_v22 }
  0x74   : > { %823 = vmatprep.subr.bf16.mxu1 %v1075_v0 }
  0x76   : > { %804 = vmatpush3.bf16.msra.mxu0 %v909_v13 }
  0x77   : > { %824 = vmatpush3.bf16.msra.mxu1 %v917_v23 }
  0xd0   : > { %v366_v14 = vpop.permute.xlu0 %365 }
  0xd1   : > { %369 = vst.msk [vmem:[#allocation2] sm:$0xff] %vm368_vm3, %v366_v14 }
  0xd4   : > { %v373_v15 = vpop.permute.xlu0 %372 }
  0xd5   : > { %376 = vst.msk [vmem:[#allocation2] sm:$0xff] %vm375_vm4, %v373_v15 }
  0xdc   : > { %v377_v16 = vld [vmem:[#allocation2] sm:$0xff] }
  0xdd   : > { %v378_v17 = vpack.c.bf16 %v377_v16, %v377_v16 }
  0xdf   : > { %806 = vmatmul.mubr.bf16.vlgmr.msra.gmra.mxu0 %v378_v17 }
 0x19f   : > { %v484_v25 = vpop.f32.mrf.mxu0 }
 0x1a0   : > { %v485_v26 = vadd.f32 %v749_v24, %v484_v25 }
 0x1a1   : > { %v807_v27 = vpop.f32.mrf.mxu0 }
 0x1a2   : > { %v491_v28 = vmul.f32 0.70710677, %v485_v26  ;;  %v490_v32 = vmul.f32 0.5, %v485_v26 }
 0x1a3   : > { %v487_v29 = vpop.f32.mrf.mxu0 }
 0x1a4   : > { %918 = verf.f32 %v491_v28 }
 0x1a5   : > { %v808_v30 = vpop.f32.mrf.mxu0 }
 0x1b1   : > { %v919_v31 = vpop.eup %918 }
 0x1b2   : > { %v493_v33 = vadd.f32 1.0, %v919_v31 }
 0x1b4   : > { %v494_v34 = vmul.f32 %v493_v33, %v490_v32 }
 0x1b6   : > { %v495_v35 = vpack.c.bf16 %v494_v34, %v494_v34 }
 0x1b8   : > { %826 = vmatmul.mubr.bf16.vlgmr.msra.gmra.mxu1 %v495_v35 }
 0x278   : > { %v601_v37 = vpop.f32.mrf.mxu1 }
 0x279   : > { %v602_v38 = vadd.f32 %v758_v36, %v601_v37 }
 0x27a   : > { %v827_v39 = vpop.f32.mrf.mxu1 }
 0x27b   : > { %607 = vst [vmem:[%s348_s30] sm:$0xff] %v602_v38 }
 0x27c   : > { %v604_v40 = vpop.f32.mrf.mxu1 }
 0x27d   : > { %1013 = shalt.err (!%p1010_p13)
}
 0x27e   : > { %s1014_s15 = scalar_lea.hbm %s1291_s22, 128  ;;  %s1018_s13 = scalar_lea.hbm %s1341_s7, 256 }
 0x27f   : > { %p1015_p5 = scmp.ne.s32.totalorder %s1291_s22, %s1014_s15  ;;  %p1019_p8 = scmp.lt.s32.totalorder %s1291_s22, %s1341_s7 }
 0x280   : > { %p1020_p3 = scmp.lt.s32.totalorder %s1018_s13, %s1014_s15 }
 0x281   : > { %p1016_p10 = pnand %p1015_p5, %p1361_p1 }
 0x282   : > { %p1021_p11 = por %p1020_p3, %p1019_p8 }
 0x283   : > { %p1017_p4 = pneg %p1016_p10 }
 0x285   : > { %p1022_p0 = pnand %p1021_p11, %p1017_p4 }
 0x287   : > { %1025 = shalt.err (!%p1022_p0)
}
 0x288   : > { %839 = dma.vmem_to_hbm [thread:$0]  (%p1361_p1), %s1293_s18, 128, %s1291_s22, %s609_s14   ;;  %v828_v41 = vpop.f32.mrf.mxu1 }
 0x289 PF: > { %s634_s9 = sand.u32 1, %s1056_s24   ;;  %p1362_p2 = scmp.ne.s32.totalorder %s1349_s8, 0 }
 0x28a   : > { %p1363_p6 = scmp.ge.s32.totalorder %s1068_s27, 2  ;;  %s635_s30 = scalar_lea.sflag [#allocation5], %s634_s9 }
 0x28c   : > { %p853_p12 = pnand %p1363_p6, %p1362_p2 }
 0x28e   : > { %p854_p7 = pneg %p853_p12 }
 0x290   : > { %1051 = dma.done.wait (%p854_p7), %s635_s30, 128  }
 0x291   : > { %1053 = vsyncadd (%p854_p7), %s635_s30, 4294967168  ;;  %p21_p9 = scmp.ge.s32.totalorder %s1192_s23, 4   ;;  %s1364_s24 = smov %s1060_s25 }
 0x292   : > { %s1365_s25 = smov %s1064_s26  ;;  %s1366_s26 = smov %s1208_s12 }
 0x293   : > { %s1367_s27 = smov %s1192_s23  ;;  %23 = sbr.rel (!%p21_p9) target bundleno = 9 (0x9), region = 107 }
 0x298   :  { %640 = vsyncpa [#allocation4], 1 }
 0x299   :  { %642 = vsyncpa [#allocation4 + $0x1], 1 }
 0x29a   :  { %643 = vsyncpa [#allocation7], 1 }
 0x29b   :  { %644 = vsyncpa [#allocation5], 1 }
 0x29c   :  { %646 = vsyncpa [#allocation5 + $0x1], 1 }

</bundles_post_ra>
